<compile_context>
chip_gen: v5e
topology: v5e:2x2
jax: 0.10.0
libtpu: 0.0.40
codegen_flags: <defaults>
</compile_context>

<pallas_src>
import jax
import jax.numpy as jnp
from jax import lax
from jax.experimental import pallas as pl
from jax.experimental.pallas import tpu as pltpu

BN_EPS = 1e-5


def residual_kernel(x_ref, w13_ref, w2_ref, p_ref, out_ref):
    """All refs live in VMEM.

    x_ref   : (N, Cin)        one row per sample (spatial is 1x1)
    w13_ref : (2, Cin, Cout)  [0] = conv1 weight^T, [1] = conv3 weight^T
    w2_ref  : (Cout, Cout)    conv2 weight^T
    p_ref   : (8, Cout)       rows: b1, g1, be1, b2, g2, be2, b3, <pad>
    out_ref : (4*N, Cout)     pooled output, quadrant-major:
                              row q*N + n  ->  sample n, (ph, pw) = (q // 2, q % 2)
    """
    N = x_ref.shape[0]
    x = x_ref[...]
    p = p_ref[...]
    b1, g1, be1 = p[0:1, :], p[1:2, :], p[2:3, :]
    b2, g2, be2 = p[3:4, :], p[4:5, :], p[5:6, :]
    b3 = p[6:7, :]

    # ---- conv1 (1x1, padding=1) on a 1x1 input -> 3x3 map.  Only the centre
    # row per sample is non-trivial; the 8 zero-padded rows are exactly b1.
    y1c = jnp.dot(x, w13_ref[0], preferred_element_type=jnp.float32) + b1       # (N, Cout)

    # ---- bn1: training-mode biased batch stats over all 9N rows (+ ReLU).
    m1 = (jnp.sum(y1c, axis=0, keepdims=True) + (8.0 * N) * b1) / (9.0 * N)
    v1 = (jnp.sum((y1c - m1) ** 2, axis=0, keepdims=True)
          + (8.0 * N) * (b1 - m1) ** 2) / (9.0 * N)                             # centered form
    inv1 = lax.rsqrt(v1 + BN_EPS)
    a1c = jnp.maximum((y1c - m1) * inv1 * g1 + be1, 0.0)   # centre of the 3x3   (N, Cout)
    a1r = jnp.maximum((b1 - m1) * inv1 * g1 + be1, 0.0)    # 8 off-centre rows   (1, Cout)

    # ---- conv2 (1x1, padding=1) on the 3x3 map -> 5x5 map.
    #   16 zero-padded border rows/sample -> exactly b2
    #    8 "ring" rows/sample             -> a1r @ w2 + b2   (per-channel const)
    #    1 centre row/sample              -> a1c @ w2 + b2
    y2c = jnp.dot(a1c, w2_ref[...], preferred_element_type=jnp.float32) + b2    # (N, Cout)
    y2r = jnp.dot(a1r, w2_ref[...], preferred_element_type=jnp.float32) + b2    # (1, Cout)

    # ---- bn2: batch stats over all 25N rows of the 5x5 map (+ ReLU).
    m2 = (jnp.sum(y2c, axis=0, keepdims=True)
          + (8.0 * N) * y2r + (16.0 * N) * b2) / (25.0 * N)
    v2 = (jnp.sum((y2c - m2) ** 2, axis=0, keepdims=True)
          + (8.0 * N) * (y2r - m2) ** 2
          + (16.0 * N) * (b2 - m2) ** 2) / (25.0 * N)
    inv2 = lax.rsqrt(v2 + BN_EPS)
    a2c = jnp.maximum((y2c - m2) * inv2 * g2 + be2, 0.0)   # centre (2,2)        (N, Cout)
    a2r = jnp.maximum((y2r - m2) * inv2 * g2 + be2, 0.0)   # interior ring       (1, Cout)
    a2b = jnp.maximum((b2 - m2) * inv2 * g2 + be2, 0.0)    # padded border       (1, Cout)

    # ---- conv3 residual branch (1x1, no padding).
    res = jnp.dot(x, w13_ref[1], preferred_element_type=jnp.float32) + b3       # (N, Cout)

    # ---- out = main + residual (residual broadcasts over the 5x5 map), then
    # MaxPool2d(2, 2).  The residual is constant over a pool window, so each
    # pooled value only involves {a2b, a2r, a2c}:
    #   windows (0,0), (0,1), (1,0): {border, ring}  -> max(a2b, a2r)
    #   window  (1,1):               {centre, ring}  -> max(a2c, a2r)
    pooled_edge = res + jnp.maximum(a2b, a2r)              # (N, Cout)
    pooled_cent = res + jnp.maximum(a2c, a2r)              # (N, Cout)

    out_ref[pl.ds(0 * N, N), :] = pooled_edge   # (ph, pw) = (0, 0)
    out_ref[pl.ds(1 * N, N), :] = pooled_edge   # (0, 1)
    out_ref[pl.ds(2 * N, N), :] = pooled_edge   # (1, 0)
    out_ref[pl.ds(3 * N, N), :] = pooled_cent   # (1, 1)


def residual_forward(x_nchw, params):
    """x_nchw: (N, Cin, 1, 1) float32 -> (N, Cout, 2, 2) float32."""
    N, Cin, H, W = x_nchw.shape
    assert H == 1 and W == 1, "PyTorch module only type-checks for 1x1 spatial input"
    w1, b1, g1, be1, w2, b2, g2, be2, w3, b3 = params
    Cout = w1.shape[0]

    x2d = x_nchw[:, :, 0, 0]                                            # (N, Cin)
    w13 = jnp.stack([jnp.transpose(w1[:, :, 0, 0]),
                     jnp.transpose(w3[:, :, 0, 0])], axis=0)            # (2, Cin, Cout)
    w2t = jnp.transpose(w2[:, :, 0, 0])                                 # (Cout, Cout)
    pk = jnp.stack([b1, g1, be1, b2, g2, be2, b3,
                    jnp.zeros_like(b1)], axis=0)                        # (8, Cout)

    vmem = pl.BlockSpec(memory_space=pltpu.MemorySpace.VMEM)
    out_flat = pl.pallas_call(
        residual_kernel,
        out_shape=jax.ShapeDtypeStruct((4 * N, Cout), jnp.float32),
        in_specs=[vmem, vmem, vmem, vmem],
        out_specs=vmem,
    )(x2d, w13, w2t, pk)
    # quadrant-major rows (q, n) -> NCHW (n, c, ph, pw)
    return jnp.transpose(out_flat.reshape(2, 2, N, Cout), (2, 3, 0, 1))


def residual_reference(x, params):
    """Pure-JAX reference mirroring the PyTorch forward (NCHW)."""
    w1, b1, g1, be1, w2, b2, g2, be2, w3, b3 = params

    def conv1x1(x, w, b, pad):
        if pad:
            x = jnp.pad(x, ((0, 0), (0, 0), (pad, pad), (pad, pad)))
        return jnp.einsum('nchw,oc->nohw', x, w[:, :, 0, 0]) + b[None, :, None, None]

    def bn_train(x, g, be):
        m = jnp.mean(x, axis=(0, 2, 3), keepdims=True)
        v = jnp.mean((x - m) ** 2, axis=(0, 2, 3), keepdims=True)
        return (x - m) / jnp.sqrt(v + BN_EPS) * g[None, :, None, None] + be[None, :, None, None]

    h = jax.nn.relu(bn_train(conv1x1(x, w1, b1, 1), g1, be1))
    h = jax.nn.relu(bn_train(conv1x1(h, w2, b2, 1), g2, be2))
    out = h + conv1x1(x, w3, b3, 0)
    N, C, H, W = out.shape
    out = out[:, :, :(H // 2) * 2, :(W // 2) * 2].reshape(N, C, H // 2, 2, W // 2, 2)
    return out.max(axis=(3, 5))


if __name__ == "__main__":
    N, Cin, Cout = 2, 4, 8
    ks = jax.random.split(jax.random.PRNGKey(0), 12)
    x = jax.random.normal(ks[0], (N, Cin, 1, 1), jnp.float32)
    w1 = 0.5 * jax.random.normal(ks[1], (Cout, Cin, 1, 1), jnp.float32)
    b1 = 0.1 * jax.random.normal(ks[2], (Cout,), jnp.float32)
    w2 = 0.5 * jax.random.normal(ks[3], (Cout, Cout, 1, 1), jnp.float32)
    b2 = 0.1 * jax.random.normal(ks[4], (Cout,), jnp.float32)
    w3 = 0.5 * jax.random.normal(ks[5], (Cout, Cin, 1, 1), jnp.float32)
    b3 = 0.1 * jax.random.normal(ks[6], (Cout,), jnp.float32)
    g1 = 1.0 + 0.1 * jax.random.normal(ks[7], (Cout,), jnp.float32)
    be1 = 0.1 * jax.random.normal(ks[8], (Cout,), jnp.float32)
    g2 = 1.0 + 0.1 * jax.random.normal(ks[9], (Cout,), jnp.float32)
    be2 = 0.1 * jax.random.normal(ks[10], (Cout,), jnp.float32)
    params = (w1, b1, g1, be1, w2, b2, g2, be2, w3, b3)

    out = jax.block_until_ready(residual_forward(x, params))
    ref = residual_reference(x, params)
    assert out.shape == (N, Cout, 2, 2), out.shape
    assert jnp.allclose(out, ref, rtol=1e-4, atol=1e-4)
    print("KERNEL_OK")
</pallas_src>

<mosaic_0001>
module attributes {stable_mosaic.version = 11 : i64} {
  func.func @residual_kernel(%arg0: memref<2x4xf32, #tpu.memory_space<vmem>>, %arg1: memref<2x4x8xf32, #tpu.memory_space<vmem>>, %arg2: memref<8x8xf32, #tpu.memory_space<vmem>>, %arg3: memref<8x8xf32, #tpu.memory_space<vmem>>, %arg4: memref<8x8xf32, #tpu.memory_space<vmem>>) attributes {dimension_semantics = [], scalar_prefetch = 0 : i64, scratch_operands = 0 : i64, tpu.core_type = #tpu.core_type<tc>} {
    %c0 = arith.constant 0 : index
    %c0_0 = arith.constant 0 : index
    %0 = vector.load %arg0[%c0, %c0_0] : memref<2x4xf32, #tpu.memory_space<vmem>>, vector<2x4xf32>
    %c0_1 = arith.constant 0 : index
    %c0_2 = arith.constant 0 : index
    %1 = vector.load %arg3[%c0_1, %c0_2] : memref<8x8xf32, #tpu.memory_space<vmem>>, vector<8x8xf32>
    %2 = vector.extract_strided_slice %1 {offsets = [0, 0], sizes = [1, 8], strides = [1, 1]} : vector<8x8xf32> to vector<1x8xf32>
    %3 = vector.extract_strided_slice %1 {offsets = [1, 0], sizes = [1, 8], strides = [1, 1]} : vector<8x8xf32> to vector<1x8xf32>
    %4 = vector.extract_strided_slice %1 {offsets = [2, 0], sizes = [1, 8], strides = [1, 1]} : vector<8x8xf32> to vector<1x8xf32>
    %5 = vector.extract_strided_slice %1 {offsets = [3, 0], sizes = [1, 8], strides = [1, 1]} : vector<8x8xf32> to vector<1x8xf32>
    %6 = vector.extract_strided_slice %1 {offsets = [4, 0], sizes = [1, 8], strides = [1, 1]} : vector<8x8xf32> to vector<1x8xf32>
    %7 = vector.extract_strided_slice %1 {offsets = [5, 0], sizes = [1, 8], strides = [1, 1]} : vector<8x8xf32> to vector<1x8xf32>
    %8 = vector.extract_strided_slice %1 {offsets = [6, 0], sizes = [1, 8], strides = [1, 1]} : vector<8x8xf32> to vector<1x8xf32>
    %c0_3 = arith.constant 0 : index
    %c0_4 = arith.constant 0 : index
    %c0_5 = arith.constant 0 : index
    %9 = vector.load %arg1[%c0_3, %c0_4, %c0_5] : memref<2x4x8xf32, #tpu.memory_space<vmem>>, vector<1x4x8xf32>
    %10 = vector.shape_cast %9 : vector<1x4x8xf32> to vector<4x8xf32>
    %cst = arith.constant dense<0.000000e+00> : vector<2x8xf32>
    %11 = tpu.matmul %0, %10, %cst {dimension_numbers = #tpu.dot_dimension_numbers<[1], [0], [0], [1], [0, 0, 1, 1], [], []>} : vector<2x4xf32>, vector<4x8xf32>, vector<2x8xf32> -> vector<2x8xf32>
    %12 = vector.broadcast %2 : vector<1x8xf32> to vector<2x8xf32>
    %13 = arith.addf %11, %12 : vector<2x8xf32>
    %cst_6 = arith.constant dense<0.000000e+00> : vector<8xf32>
    %14 = vector.multi_reduction <add>, %13, %cst_6 [0] : vector<2x8xf32> to vector<8xf32>
    %15 = vector.shape_cast %14 : vector<8xf32> to vector<1x8xf32>
    %cst_7 = arith.constant 1.600000e+01 : f32
    %16 = vector.broadcast %cst_7 : f32 to vector<1x8xf32>
    %17 = arith.mulf %16, %2 : vector<1x8xf32>
    %18 = arith.addf %15, %17 : vector<1x8xf32>
    %cst_8 = arith.constant 1.800000e+01 : f32
    %19 = vector.broadcast %cst_8 : f32 to vector<1x8xf32>
    %20 = arith.divf %18, %19 : vector<1x8xf32>
    %21 = vector.broadcast %20 : vector<1x8xf32> to vector<2x8xf32>
    %22 = arith.subf %13, %21 : vector<2x8xf32>
    %23 = arith.mulf %22, %22 : vector<2x8xf32>
    %cst_9 = arith.constant dense<0.000000e+00> : vector<8xf32>
    %24 = vector.multi_reduction <add>, %23, %cst_9 [0] : vector<2x8xf32> to vector<8xf32>
    %25 = vector.shape_cast %24 : vector<8xf32> to vector<1x8xf32>
    %26 = arith.subf %2, %20 : vector<1x8xf32>
    %27 = arith.mulf %26, %26 : vector<1x8xf32>
    %cst_10 = arith.constant 1.600000e+01 : f32
    %28 = vector.broadcast %cst_10 : f32 to vector<1x8xf32>
    %29 = arith.mulf %28, %27 : vector<1x8xf32>
    %30 = arith.addf %25, %29 : vector<1x8xf32>
    %cst_11 = arith.constant 1.800000e+01 : f32
    %31 = vector.broadcast %cst_11 : f32 to vector<1x8xf32>
    %32 = arith.divf %30, %31 : vector<1x8xf32>
    %cst_12 = arith.constant 9.99999974E-6 : f32
    %33 = vector.broadcast %cst_12 : f32 to vector<1x8xf32>
    %34 = arith.addf %32, %33 : vector<1x8xf32>
    %35 = math.rsqrt %34 : vector<1x8xf32>
    %36 = vector.broadcast %20 : vector<1x8xf32> to vector<2x8xf32>
    %37 = arith.subf %13, %36 : vector<2x8xf32>
    %38 = vector.broadcast %35 : vector<1x8xf32> to vector<2x8xf32>
    %39 = arith.mulf %37, %38 : vector<2x8xf32>
    %40 = vector.broadcast %3 : vector<1x8xf32> to vector<2x8xf32>
    %41 = arith.mulf %39, %40 : vector<2x8xf32>
    %42 = vector.broadcast %4 : vector<1x8xf32> to vector<2x8xf32>
    %43 = arith.addf %41, %42 : vector<2x8xf32>
    %cst_13 = arith.constant 0.000000e+00 : f32
    %44 = vector.broadcast %cst_13 : f32 to vector<2x8xf32>
    %45 = arith.maximumf %43, %44 : vector<2x8xf32>
    %46 = arith.subf %2, %20 : vector<1x8xf32>
    %47 = arith.mulf %46, %35 : vector<1x8xf32>
    %48 = arith.mulf %47, %3 : vector<1x8xf32>
    %49 = arith.addf %48, %4 : vector<1x8xf32>
    %cst_14 = arith.constant 0.000000e+00 : f32
    %50 = vector.broadcast %cst_14 : f32 to vector<1x8xf32>
    %51 = arith.maximumf %49, %50 : vector<1x8xf32>
    %c0_15 = arith.constant 0 : index
    %c0_16 = arith.constant 0 : index
    %52 = vector.load %arg2[%c0_15, %c0_16] : memref<8x8xf32, #tpu.memory_space<vmem>>, vector<8x8xf32>
    %cst_17 = arith.constant dense<0.000000e+00> : vector<2x8xf32>
    %53 = tpu.matmul %45, %52, %cst_17 {dimension_numbers = #tpu.dot_dimension_numbers<[1], [0], [0], [1], [0, 0, 1, 1], [], []>} : vector<2x8xf32>, vector<8x8xf32>, vector<2x8xf32> -> vector<2x8xf32>
    %54 = vector.broadcast %5 : vector<1x8xf32> to vector<2x8xf32>
    %55 = arith.addf %53, %54 : vector<2x8xf32>
    %c0_18 = arith.constant 0 : index
    %c0_19 = arith.constant 0 : index
    %56 = vector.load %arg2[%c0_18, %c0_19] : memref<8x8xf32, #tpu.memory_space<vmem>>, vector<8x8xf32>
    %cst_20 = arith.constant dense<0.000000e+00> : vector<1x8xf32>
    %57 = tpu.matmul %51, %56, %cst_20 {dimension_numbers = #tpu.dot_dimension_numbers<[1], [0], [0], [1], [0, 0, 1, 1], [], []>} : vector<1x8xf32>, vector<8x8xf32>, vector<1x8xf32> -> vector<1x8xf32>
    %58 = arith.addf %57, %5 : vector<1x8xf32>
    %cst_21 = arith.constant dense<0.000000e+00> : vector<8xf32>
    %59 = vector.multi_reduction <add>, %55, %cst_21 [0] : vector<2x8xf32> to vector<8xf32>
    %60 = vector.shape_cast %59 : vector<8xf32> to vector<1x8xf32>
    %cst_22 = arith.constant 1.600000e+01 : f32
    %61 = vector.broadcast %cst_22 : f32 to vector<1x8xf32>
    %62 = arith.mulf %61, %58 : vector<1x8xf32>
    %63 = arith.addf %60, %62 : vector<1x8xf32>
    %cst_23 = arith.constant 3.200000e+01 : f32
    %64 = vector.broadcast %cst_23 : f32 to vector<1x8xf32>
    %65 = arith.mulf %64, %5 : vector<1x8xf32>
    %66 = arith.addf %63, %65 : vector<1x8xf32>
    %cst_24 = arith.constant 5.000000e+01 : f32
    %67 = vector.broadcast %cst_24 : f32 to vector<1x8xf32>
    %68 = arith.divf %66, %67 : vector<1x8xf32>
    %69 = vector.broadcast %68 : vector<1x8xf32> to vector<2x8xf32>
    %70 = arith.subf %55, %69 : vector<2x8xf32>
    %71 = arith.mulf %70, %70 : vector<2x8xf32>
    %cst_25 = arith.constant dense<0.000000e+00> : vector<8xf32>
    %72 = vector.multi_reduction <add>, %71, %cst_25 [0] : vector<2x8xf32> to vector<8xf32>
    %73 = vector.shape_cast %72 : vector<8xf32> to vector<1x8xf32>
    %74 = arith.subf %58, %68 : vector<1x8xf32>
    %75 = arith.mulf %74, %74 : vector<1x8xf32>
    %cst_26 = arith.constant 1.600000e+01 : f32
    %76 = vector.broadcast %cst_26 : f32 to vector<1x8xf32>
    %77 = arith.mulf %76, %75 : vector<1x8xf32>
    %78 = arith.addf %73, %77 : vector<1x8xf32>
    %79 = arith.subf %5, %68 : vector<1x8xf32>
    %80 = arith.mulf %79, %79 : vector<1x8xf32>
    %cst_27 = arith.constant 3.200000e+01 : f32
    %81 = vector.broadcast %cst_27 : f32 to vector<1x8xf32>
    %82 = arith.mulf %81, %80 : vector<1x8xf32>
    %83 = arith.addf %78, %82 : vector<1x8xf32>
    %cst_28 = arith.constant 5.000000e+01 : f32
    %84 = vector.broadcast %cst_28 : f32 to vector<1x8xf32>
    %85 = arith.divf %83, %84 : vector<1x8xf32>
    %cst_29 = arith.constant 9.99999974E-6 : f32
    %86 = vector.broadcast %cst_29 : f32 to vector<1x8xf32>
    %87 = arith.addf %85, %86 : vector<1x8xf32>
    %88 = math.rsqrt %87 : vector<1x8xf32>
    %89 = vector.broadcast %68 : vector<1x8xf32> to vector<2x8xf32>
    %90 = arith.subf %55, %89 : vector<2x8xf32>
    %91 = vector.broadcast %88 : vector<1x8xf32> to vector<2x8xf32>
    %92 = arith.mulf %90, %91 : vector<2x8xf32>
    %93 = vector.broadcast %6 : vector<1x8xf32> to vector<2x8xf32>
    %94 = arith.mulf %92, %93 : vector<2x8xf32>
    %95 = vector.broadcast %7 : vector<1x8xf32> to vector<2x8xf32>
    %96 = arith.addf %94, %95 : vector<2x8xf32>
    %cst_30 = arith.constant 0.000000e+00 : f32
    %97 = vector.broadcast %cst_30 : f32 to vector<2x8xf32>
    %98 = arith.maximumf %96, %97 : vector<2x8xf32>
    %99 = arith.subf %58, %68 : vector<1x8xf32>
    %100 = arith.mulf %99, %88 : vector<1x8xf32>
    %101 = arith.mulf %100, %6 : vector<1x8xf32>
    %102 = arith.addf %101, %7 : vector<1x8xf32>
    %cst_31 = arith.constant 0.000000e+00 : f32
    %103 = vector.broadcast %cst_31 : f32 to vector<1x8xf32>
    %104 = arith.maximumf %102, %103 : vector<1x8xf32>
    %105 = arith.subf %5, %68 : vector<1x8xf32>
    %106 = arith.mulf %105, %88 : vector<1x8xf32>
    %107 = arith.mulf %106, %6 : vector<1x8xf32>
    %108 = arith.addf %107, %7 : vector<1x8xf32>
    %cst_32 = arith.constant 0.000000e+00 : f32
    %109 = vector.broadcast %cst_32 : f32 to vector<1x8xf32>
    %110 = arith.maximumf %108, %109 : vector<1x8xf32>
    %c1 = arith.constant 1 : index
    %c0_33 = arith.constant 0 : index
    %c0_34 = arith.constant 0 : index
    %111 = vector.load %arg1[%c1, %c0_33, %c0_34] : memref<2x4x8xf32, #tpu.memory_space<vmem>>, vector<1x4x8xf32>
    %112 = vector.shape_cast %111 : vector<1x4x8xf32> to vector<4x8xf32>
    %cst_35 = arith.constant dense<0.000000e+00> : vector<2x8xf32>
    %113 = tpu.matmul %0, %112, %cst_35 {dimension_numbers = #tpu.dot_dimension_numbers<[1], [0], [0], [1], [0, 0, 1, 1], [], []>} : vector<2x4xf32>, vector<4x8xf32>, vector<2x8xf32> -> vector<2x8xf32>
    %114 = vector.broadcast %8 : vector<1x8xf32> to vector<2x8xf32>
    %115 = arith.addf %113, %114 : vector<2x8xf32>
    %116 = arith.maximumf %110, %104 : vector<1x8xf32>
    %117 = vector.broadcast %116 : vector<1x8xf32> to vector<2x8xf32>
    %118 = arith.addf %115, %117 : vector<2x8xf32>
    %119 = vector.broadcast %104 : vector<1x8xf32> to vector<2x8xf32>
    %120 = arith.maximumf %98, %119 : vector<2x8xf32>
    %121 = arith.addf %115, %120 : vector<2x8xf32>
    %c0_36 = arith.constant 0 : index
    %c0_37 = arith.constant 0 : index
    %122 = vector.load %arg4[%c0_36, %c0_37] : memref<8x8xf32, #tpu.memory_space<vmem>>, vector<2x8xf32>
    tpu.vector_store %arg4[%c0_36, %c0_37], %118 {strides = array<i32>} : memref<8x8xf32, #tpu.memory_space<vmem>>, vector<2x8xf32>,
    %c2 = arith.constant 2 : index
    %c0_38 = arith.constant 0 : index
    %123 = vector.load %arg4[%c2, %c0_38] : memref<8x8xf32, #tpu.memory_space<vmem>>, vector<2x8xf32>
    tpu.vector_store %arg4[%c2, %c0_38], %118 {strides = array<i32>} : memref<8x8xf32, #tpu.memory_space<vmem>>, vector<2x8xf32>,
    %c4 = arith.constant 4 : index
    %c0_39 = arith.constant 0 : index
    %124 = vector.load %arg4[%c4, %c0_39] : memref<8x8xf32, #tpu.memory_space<vmem>>, vector<2x8xf32>
    tpu.vector_store %arg4[%c4, %c0_39], %118 {strides = array<i32>} : memref<8x8xf32, #tpu.memory_space<vmem>>, vector<2x8xf32>,
    %c6 = arith.constant 6 : index
    %c0_40 = arith.constant 0 : index
    %125 = vector.load %arg4[%c6, %c0_40] : memref<8x8xf32, #tpu.memory_space<vmem>>, vector<2x8xf32>
    tpu.vector_store %arg4[%c6, %c0_40], %121 {strides = array<i32>} : memref<8x8xf32, #tpu.memory_space<vmem>>, vector<2x8xf32>,
    return
  }
}

</mosaic_0001>

<bundles_post_ra>
// kernel: tpu_custom_call.1
= control target key start
LH: loop header
LB: loop body
LE: loop exit
PB: predicated region body
PF: predicated region fallthrough
CT: control target
= control target key end

     0   :  { %9 = vsyncpa [#allocation3], 0  ;;  %s594_s0 = inlined_call_operand.hbm [shape: f32[2,4], index: 0, kind: input, shape index: {}]   ;;  %s595_s1 = inlined_call_operand.hbm [shape: f32[2,4,8], index: 1, kind: input, shape index: {}]   ;;  %s596_s2 = inlined_call_operand.hbm [shape: f32[8,8], index: 2, kind: input, shape index: {}]   ;;  %s597_s3 = inlined_call_operand.hbm [shape: f32[8,8], index: 3, kind: input, shape index: {}]   ;;  %s598_s4 = inlined_call_operand.hbm [shape: f32[8,8], index: 4, kind: output, shape index: {}]  }
   0x1   :  { %10 = vsyncpa [#allocation6], 0 }
   0x2   :  { %11 = vsyncpa [#allocation9], 0  ;;  %s28_s17 = sshll.u32 %s595_s1, 4  ;;  %s29_s17 = int_to_ptr.hbm [resolvable:$true] %s28_s17 }
   0x3   :  { %12 = vsyncpa [#allocation4], 0  ;;  %s507_s18 = smov [#allocation5]   ;;  %s18_s22 = sshll.u32 %s594_s0, 4  ;;  %s19_s22 = int_to_ptr.hbm [resolvable:$true] %s18_s22 }
   0x4   :  { %s30_s19 = sshll.u32 %s507_s18, 4  ;;  %s508_s23 = smov 64   ;;  %s31_s19 = int_to_ptr.vmem [resolvable:$true] %s30_s19 }
   0x5   :  { %s509_s24 = smov 4   ;;  %s510_s25 = smov [#allocation2]  }
   0x6   :  { %36 = dma.hbm_to_vmem [thread:$0]  %s29_s17, 128, %s31_s19, [#allocation6], %s508_s23, %s508_s23, %s509_s24  }
   0x7   :  { %s20_s26 = sshll.u32 %s510_s25, 4  ;;  %s42_s29 = sshll.u32 %s596_s2, 4  ;;  %s21_s26 = int_to_ptr.vmem [resolvable:$true] %s20_s26  ;;  %s43_s29 = int_to_ptr.hbm [resolvable:$true] %s42_s29 }
   0x8   :  { %23 = dma.hbm_to_vmem [thread:$0]  %s19_s22, 32, %s21_s26, [#allocation3]  }
   0x9   :  { %s53_s5 = sshll.u32 %s597_s3, 4  ;;  %s511_s6 = smov [#allocation7]   ;;  %s54_s5 = int_to_ptr.hbm [resolvable:$true] %s53_s5 }
   0xa   :  { %s44_s7 = sshll.u32 %s511_s6, 4  ;;  %s512_s0 = smov [#allocation8]   ;;  %s45_s7 = int_to_ptr.vmem [resolvable:$true] %s44_s7 }
   0xb   :  { %47 = dma.hbm_to_vmem [thread:$0]  %s43_s29, 128, %s45_s7, [#allocation6]  }
   0xc   :  { %s55_s8 = sshll.u32 %s512_s0, 4  ;;  %s56_s8 = int_to_ptr.vmem [resolvable:$true] %s55_s8 }
   0xd   :  { %58 = dma.hbm_to_vmem [thread:$0]  %s54_s5, 128, %s56_s8, [#allocation9]  }
   0xe   :  { %499 = dma.done.wait [#allocation3], 32  }
   0xf   :  { %500 = vsyncadd [#allocation3], 4294967264 }
  0x10   :  { %501 = dma.done.wait [#allocation6], 256  }
  0x11   :  { %502 = vsyncadd [#allocation6], 4294967040 }
  0x12   :  { %503 = dma.done.wait [#allocation9], 128  }
  0x13   :  { %504 = vsyncadd [#allocation9], 4294967168  ;;  %vm83_vm0 = vcmask 1043456   ;;  %vm79_vm1 = vcmask 31744   ;;  %v77_v0 = vld [vmem:[#allocation5] sm:$0xf] }
  0x14   :  { %v75_v1 = vld [vmem:[#allocation2] sm:$0x3]  ;;  %356 = vmatpush.msk.msra.mxu0 %vm83_vm0, %v77_v0  ;;  %v513_v2 = vmov 18.0   ;;  %v555_v3 = vld [vmem:[#allocation8] sm:$0xff]  ;;  %vm107_vm2 = vcmask 58368   ;;  %v167_v33 = vld [vmem:[#allocation7] sm:$0xff] }
  0x15   :  { %357 = vmatmul.msk.f32.vlgmr.msra.gmra.mxu0 %vm79_vm1, %v75_v1  ;;  %371 = vrcp.f32 %v513_v2  ;;  %v78_v5 = vperm.slane %v555_v3, 0  ;;  %v115_v18 = vmul.f32 16.0, %v555_v3  ;;  %213 = vmatpush.msra.mxu2 %v167_v33  ;;  %v299_v39 = vld [vmem:[#allocation5 + $0x4] sm:$0xf]  ;;  %v160_v47 = vrot.slane %v555_v3, 1  ;;  %s515_s2 = smov [#allocation10]  }
  0x16   :  { %188 = vmatpush.msra.mxu1 %v167_v33  ;;  %360 = vmatpush.msk.msra.mxu3 %vm83_vm0, %v299_v39  ;;  %v163_v51 = vrot.slane %v555_v3, 2  ;;  %v153_v52 = vperm.slane %v555_v3, 1  ;;  %v155_v55 = vperm.slane %v555_v3, 2  ;;  %vm169_vm7 = vcmask 64512   ;;  %s342_s3 = sshll.u32 %s515_s2, 4  ;;  %s344_s11 = sshll.u32 %s598_s4, 4  ;;  %s343_s3 = int_to_ptr.vmem [resolvable:$true] %s342_s3  ;;  %s345_s11 = int_to_ptr.hbm [resolvable:$true] %s344_s11 }
  0x17   :  { %361 = vmatmul.msk.f32.vlgmr.msra.gmra.mxu3 %vm79_vm1, %v75_v1  ;;  %v514_v61 = vmov 50.0   ;;  %v168_v62 = vperm.slane %v555_v3, 3 }
  0x1b   :  { %v372_v4 = vpop.eup %371 }
  0x1c   :  { %v118_v6 = vmul.f32 18.0, %v372_v4  ;;  %vm122_vm3 = vweird.f32 %v372_v4 }
  0x1e   :  { %v119_v10 = vsub.f32 1.0, %v118_v6 }
  0x20   :  { %v120_v13 = vmul.f32 %v372_v4, %v119_v10 }
  0x22   :  { %v121_v16 = vadd.f32 %v372_v4, %v120_v13 }
  0x24   :  { %v123_v20 = vsel %vm122_vm3, %v372_v4, %v121_v16 }
  0x92   :  { %v104_v7 = vpop.f32.mrf.mxu0 }
  0x93   :  { %v105_v8 = vadd.f32 %v104_v7, %v78_v5 }
  0x95   :  { %v108_v9 = vsel %vm107_vm2, %v105_v8, 0.0 }
  0x96   :  { %v109_v11 = vrot.slane %v108_v9, 4 }
  0x98   :  { %v110_v12 = vadd.f32 %v109_v11, %v108_v9 }
  0x9a   :  { %v111_v14 = vrot.slane %v110_v12, 2 }
  0x9c   :  { %v112_v15 = vadd.f32 %v111_v14, %v110_v12  ;;  %v227_v14 = vmul.f32 32.0, %v555_v3 }
  0x9e   :  { %v113_v17 = vrot.slane %v112_v15, 1 }
  0xa0   :  { %v114_v19 = vadd.f32 %v113_v17, %v112_v15 }
  0xa2   :  { %v116_v21 = vadd.f32 %v115_v18, %v114_v19  ;;  %v229_v19 = vrot.slane %v227_v14, 3 }
  0xa4   :  { %v124_v22 = vmul.f32 %v123_v20, %v116_v21 }
  0xa6   :  { %v125_v23 = vperm.slane %v124_v22, 0  ;;  %v135_v29 = vsub.f32 %v555_v3, %v124_v22 }
  0xa8   :  { %v126_v24 = vsub.f32 %v105_v8, %v125_v23  ;;  %v136_v32 = vmul.f32 %v135_v29, %v135_v29  ;;  %v193_v8 = vrot.slane %v555_v3, 3 }
  0xaa   :  { %v127_v25 = vmul.f32 %v126_v24, %v126_v24  ;;  %v137_v36 = vmul.f32 16.0, %v136_v32 }
  0xac   :  { %v128_v26 = vsel %vm107_vm2, %v127_v25, 0.0 }
  0xad   :  { %v129_v27 = vrot.slane %v128_v26, 4 }
  0xaf   :  { %v130_v28 = vadd.f32 %v129_v27, %v128_v26 }
  0xb1   :  { %v131_v30 = vrot.slane %v130_v28, 2 }
  0xb3   :  { %v132_v31 = vadd.f32 %v131_v30, %v130_v28 }
  0xb5   :  { %v133_v34 = vrot.slane %v132_v31, 1 }
  0xb7   :  { %v134_v35 = vadd.f32 %v133_v34, %v132_v31 }
  0xb9   :  { %v138_v37 = vadd.f32 %v137_v36, %v134_v35 }
  0xbb   :  { %v139_v38 = vmul.f32 %v138_v37, %v123_v20 }
  0xbd   :  { %v140_v40 = vadd.f32 1e-05, %v139_v38 }
  0xbf   :  { %373 = vrsqrt.f32 %v140_v40  ;;  %vm147_vm5 = vweird.f32 %v140_v40 }
  0xc0   :  { %375 = vrcp.f32 %v514_v61 }
  0xc5   :  { %v374_v41 = vpop.eup %373 }
  0xc6   :  { %v142_v42 = vmul.f32 %v374_v41, %v140_v40  ;;  %vm148_vm4 = vweird.f32 %v374_v41  ;;  %v376_v63 = vpop.eup %375 }
  0xc7   :  { %vm149_vm6 = vmor %vm147_vm5, %vm148_vm4  ;;  %v233_v2 = vmul.f32 50.0, %v376_v63  ;;  %vm237_vm8 = vweird.f32 %v376_v63 }
  0xc8   :  { %v143_v43 = vmul.f32 %v374_v41, %v142_v42 }
  0xc9   :  { %v234_v6 = vsub.f32 1.0, %v233_v2 }
  0xca   :  { %v144_v44 = vmul.f32 0.5, %v143_v43 }
  0xcb   :  { %v235_v11 = vmul.f32 %v376_v63, %v234_v6  ;;  %v321_v6 = vpop.f32.mrf.mxu3 }
  0xcc   :  { %v145_v45 = vsub.f32 1.5, %v144_v44 }
  0xcd   :  { %v236_v16 = vadd.f32 %v376_v63, %v235_v11 }
  0xce   :  { %v146_v46 = vmul.f32 %v374_v41, %v145_v45 }
  0xcf   :  { %v238_v21 = vsel %vm237_vm8, %v376_v63, %v236_v16 }
  0xd0   :  { %v150_v48 = vsel %vm149_vm6, %v374_v41, %v146_v46 }
  0xd1   :  { %v151_v49 = vperm.slane %v150_v48, 0  ;;  %v158_v50 = vmul.f32 %v150_v48, %v135_v29 }
  0xd3   :  { %v152_v53 = vmul.f32 %v151_v49, %v126_v24  ;;  %v162_v54 = vmul.f32 %v160_v47, %v158_v50 }
  0xd5   :  { %v165_v56 = vadd.f32 %v163_v51, %v162_v54  ;;  %v154_v57 = vmul.f32 %v153_v52, %v152_v53  ;;  %v284_v54 = vrot.slane %v555_v3, 4 }
  0xd7   :  { %v166_v58 = vmax.f32 %v165_v56, 0.0  ;;  %v156_v59 = vadd.f32 %v155_v55, %v154_v57  ;;  %v287_v56 = vrot.slane %v555_v3, 5 }
  0xd9   :  { %359 = vmatmul.msk.f32.vlgmr.msra.gmra.mxu2 %vm169_vm7, %v166_v58  ;;  %v157_v60 = vmax.f32 %v156_v59, 0.0 }
  0xdb   :  { %358 = vmatmul.msk.f32.vlgmr.msra.gmra.mxu1 %vm169_vm7, %v157_v60  ;;  %v278_v60 = vperm.slane %v555_v3, 4 }
 0x158   :  { %v190_v0 = vpop.f32.mrf.mxu1 }
 0x159   :  { %v191_v1 = vadd.f32 %v190_v0, %v168_v62  ;;  %v280_v0 = vperm.slane %v555_v3, 5 }
 0x15b   :  { %v218_v4 = vsel %vm107_vm2, %v191_v1, 0.0 }
 0x15c   :  { %v219_v5 = vrot.slane %v218_v4, 4  ;;  %v215_v9 = vpop.f32.mrf.mxu2 }
 0x15d   :  { %v216_v13 = vadd.f32 %v215_v9, %v193_v8 }
 0x15e   :  { %v220_v7 = vadd.f32 %v219_v5, %v218_v4 }
 0x15f   :  { %v225_v18 = vmul.f32 16.0, %v216_v13 }
 0x160   :  { %v221_v10 = vrot.slane %v220_v7, 2 }
 0x162   :  { %v222_v12 = vadd.f32 %v221_v10, %v220_v7 }
 0x164   :  { %v223_v15 = vrot.slane %v222_v12, 1 }
 0x166   :  { %v224_v17 = vadd.f32 %v223_v15, %v222_v12 }
 0x168   :  { %v226_v20 = vadd.f32 %v225_v18, %v224_v17 }
 0x16a   :  { %v231_v22 = vadd.f32 %v229_v19, %v226_v20 }
 0x16c   :  { %v239_v23 = vmul.f32 %v238_v21, %v231_v22 }
 0x16e   :  { %v240_v24 = vperm.slane %v239_v23, 0  ;;  %v255_v26 = vrot.slane %v239_v23, 5  ;;  %v250_v32 = vsub.f32 %v216_v13, %v239_v23 }
 0x170   :  { %v241_v25 = vsub.f32 %v191_v1, %v240_v24  ;;  %v257_v30 = vsub.f32 %v555_v3, %v255_v26  ;;  %v251_v36 = vmul.f32 %v250_v32, %v250_v32  ;;  %v300_v1 = vperm.slane %v555_v3, 6 }
 0x172   :  { %v242_v27 = vmul.f32 %v241_v25, %v241_v25  ;;  %v258_v34 = vmul.f32 %v257_v30, %v257_v30  ;;  %v252_v40 = vmul.f32 16.0, %v251_v36  ;;  %v322_v10 = vadd.f32 %v321_v6, %v300_v1 }
 0x174   :  { %v243_v28 = vsel %vm107_vm2, %v242_v27, 0.0  ;;  %v259_v38 = vmul.f32 32.0, %v258_v34 }
 0x175   :  { %v244_v29 = vrot.slane %v243_v28, 4 }
 0x176   :  { %v261_v42 = vrot.slane %v259_v38, 3 }
 0x177   :  { %v245_v31 = vadd.f32 %v244_v29, %v243_v28 }
 0x179   :  { %v246_v33 = vrot.slane %v245_v31, 2 }
 0x17b   :  { %v247_v35 = vadd.f32 %v246_v33, %v245_v31 }
 0x17d   :  { %v248_v37 = vrot.slane %v247_v35, 1 }
 0x17f   :  { %v249_v39 = vadd.f32 %v248_v37, %v247_v35 }
 0x181   :  { %v253_v41 = vadd.f32 %v252_v40, %v249_v39 }
 0x183   :  { %v263_v43 = vadd.f32 %v261_v42, %v253_v41 }
 0x185   :  { %v264_v44 = vmul.f32 %v263_v43, %v238_v21 }
 0x187   :  { %v265_v45 = vadd.f32 1e-05, %v264_v44 }
 0x189   :  { %377 = vrsqrt.f32 %v265_v45  ;;  %vm272_vm10 = vweird.f32 %v265_v45 }
 0x18f   :  { %v378_v46 = vpop.eup %377 }
 0x190   :  { %v267_v48 = vmul.f32 %v378_v46, %v265_v45  ;;  %vm273_vm9 = vweird.f32 %v378_v46 }
 0x191   :  { %vm274_vm11 = vmor %vm272_vm10, %vm273_vm9 }
 0x192   :  { %v268_v49 = vmul.f32 %v378_v46, %v267_v48 }
 0x194   :  { %v269_v50 = vmul.f32 0.5, %v268_v49 }
 0x196   :  { %v270_v52 = vsub.f32 1.5, %v269_v50 }
 0x198   :  { %v271_v53 = vmul.f32 %v378_v46, %v270_v52 }
 0x19a   :  { %v275_v55 = vsel %vm274_vm11, %v378_v46, %v271_v53 }
 0x19b   :  { %v276_v57 = vperm.slane %v275_v55, 0  ;;  %v283_v58 = vmul.f32 %v275_v55, %v250_v32  ;;  %v292_v59 = vrot.slane %v275_v55, 5 }
 0x19d   :  { %v286_v61 = vmul.f32 %v284_v54, %v283_v58  ;;  %v294_v62 = vmul.f32 %v292_v59, %v257_v30  ;;  %v277_v63 = vmul.f32 %v276_v57, %v241_v25 }
 0x19f   :  { %v289_v2 = vadd.f32 %v287_v56, %v286_v61  ;;  %v279_v4 = vmul.f32 %v278_v60, %v277_v63  ;;  %v295_v5 = vmul.f32 %v294_v62, %v160_v47 }
 0x1a1   :  { %v281_v7 = vadd.f32 %v280_v0, %v279_v4  ;;  %v290_v8 = vmax.f32 %v289_v2, 0.0  ;;  %v296_v9 = vadd.f32 %v295_v5, %v163_v51 }
 0x1a3   :  { %v282_v11 = vmax.f32 %v281_v7, 0.0  ;;  %v297_v12 = vmax.f32 %v296_v9, 0.0  ;;  %v325_v13 = vrot.slane %v290_v8, 5  ;;  %v330_v14 = vperm.slane %v290_v8, 0 }
 0x1a5   :  { %v327_v15 = vmax.f32 %v297_v12, %v325_v13  ;;  %v331_v16 = vmax.f32 %v282_v11, %v330_v14 }
 0x1a7   :  { %v328_v17 = vperm.slane %v327_v15, 3  ;;  %v332_v18 = vadd.f32 %v331_v16, %v322_v10 }
 0x1a9   :  { %v329_v47 = vadd.f32 %v328_v17, %v322_v10  ;;  %336 = vst.msk [vmem:[#allocation10 + $0x6] sm:$0x3] %vm107_vm2, %v332_v18 }
 0x1ab   :  { %333 = vst.msk [vmem:[#allocation10] sm:$0x3] %vm107_vm2, %v329_v47 }
 0x1ac   :  { %334 = vst.msk [vmem:[#allocation10 + $0x2] sm:$0x3] %vm107_vm2, %v329_v47 }
 0x1ad   :  { %335 = vst.msk [vmem:[#allocation10 + $0x4] sm:$0x3] %vm107_vm2, %v329_v47 }
 0x1ae   :  { %347 = dma.vmem_to_hbm [thread:$0]  %s343_s3, 128, %s345_s11, [#allocation4]  }
 0x1af   :  { %505 = dma.done.wait [#allocation4], 128  }
 0x1b0   :  { %506 = vsyncadd [#allocation4], 4294967168 }
 0x1b1   :  { %352 = vsyncpa [#allocation3], 1 }
 0x1b2   :  { %353 = vsyncpa [#allocation6], 1 }
 0x1b3   :  { %354 = vsyncpa [#allocation9], 1 }
 0x1b4   :  { %355 = vsyncpa [#allocation4], 1 }

</bundles_post_ra>
